<compile_context>
chip_gen: v7x
topology: tpu7x:2x2x1
jax: 0.10.0
libtpu: 0.0.40
codegen_flags: <defaults>
</compile_context>

<pallas_src>
import math
import functools

import jax
import jax.numpy as jnp
from jax import lax
from jax.experimental import pallas as pl
from jax.experimental.pallas import tpu as pltpu


# ----------------------------------------------------------------------------
# Pallas kernel:   o = x + onehot(t) @ P          (per row tile)
# ----------------------------------------------------------------------------
def _rte_kernel(x_ref, t_ref, p_ref, o_ref):
    # x_ref : [tile_n, H]   activations
    # t_ref : [tile_n, 1]   int32 time indices
    # p_ref : [L, H]        projected sinusoid table  P = emb @ W.T + b
    #                       (resident, single-buffered, already in final dtype)
    # o_ref : [tile_n, H]
    tile_n = x_ref.shape[0]
    L = p_ref.shape[0]

    # Fused embedding gather on the MXU: one-hot(t) @ P.  Exact because each
    # one-hot row has a single 1.0 (exactly representable in any mm dtype).
    t = t_ref[...]                                                 # [tile_n, 1]
    cols = lax.broadcasted_iota(jnp.int32, (tile_n, L), 1)         # [tile_n, L]
    onehot = (t == cols).astype(p_ref.dtype)
    gathered = jnp.dot(onehot, p_ref[...],
                       preferred_element_type=jnp.float32)         # [tile_n, H]

    o_ref[...] = (x_ref[...] + gathered).astype(o_ref.dtype)


# ----------------------------------------------------------------------------
# Hoisted Linear: P = emb_table @ W.T + b  (tiny; do it once per param set)
# ----------------------------------------------------------------------------
def precompute_projected_table(emb_table, w, b, *, table_dtype=jnp.float32):
    p = jnp.dot(emb_table, w.T, precision=lax.Precision.HIGHEST) + b
    return p.astype(table_dtype)


def _choose_tile_n(n_rows, n_hid, itemsize, requested):
    # Budget for the pipelined x-in / out tiles (2 buffers each), kept well
    # under v7x's 64 MiB physical VMEM even after residents + compiler scratch.
    budget = 24 << 20
    max_rows = max(8, (budget // (4 * n_hid * itemsize)) // 8 * 8)
    tile_n = min(requested, max_rows)
    if n_rows <= tile_n:
        if n_rows >= 16:
            # Keep >= 2 grid steps so v7x's two TensorCores both get work;
            # second-to-last block dim must stay a multiple of 8.
            tile_n = ((pl.cdiv(n_rows, 2) + 7) // 8) * 8
        else:
            tile_n = n_rows          # single tile; block dim == full array dim
    return tile_n


# ----------------------------------------------------------------------------
# Wrapper: BlockSpecs, grid, pallas_call (no wrapper-side pad / slice passes)
# ----------------------------------------------------------------------------
def rel_temporal_encoding_from_table(x, t, p_table, *, tile_n=512):
    """out = x + p_table[t]   via one memory-bound Pallas gather+add kernel."""
    N, H = x.shape
    L = p_table.shape[0]
    itemsize = jnp.dtype(x.dtype).itemsize
    p_itemsize = jnp.dtype(p_table.dtype).itemsize

    tile_n = _choose_tile_n(N, H, itemsize, tile_n)
    grid = (pl.cdiv(N, tile_n),)      # ragged final block handled by masking

    # Tiny (N*4 B) reshape so t can be blocked as [tile_n, 1]; not an [N,H] pass.
    t_col = t.astype(jnp.int32).reshape(N, 1)

    # VMEM actually needed: double-buffered x/out/t tiles + single-buffered P;
    # add headroom, never below the 32 MiB default, cap below v7x physical.
    tile_bytes = tile_n * H * itemsize
    needed = 4 * tile_bytes + 2 * tile_n * 4 + L * H * p_itemsize
    vmem_limit = int(min(max(needed + (8 << 20), 32 << 20), 48 << 20))

    cost = pl.CostEstimate(
        flops=2 * N * L * H,
        transcendentals=0,
        bytes_accessed=2 * N * H * itemsize + N * 4 + L * H * p_itemsize,
    )

    return pl.pallas_call(
        _rte_kernel,
        out_shape=jax.ShapeDtypeStruct((N, H), x.dtype),
        grid=grid,
        in_specs=[
            pl.BlockSpec((tile_n, H), lambda i: (i, 0)),              # x tile
            pl.BlockSpec((tile_n, 1), lambda i: (i, 0)),              # t tile
            pl.BlockSpec((L, H), lambda i: (0, 0),
                         pipeline_mode=pl.Buffered(1)),               # resident P
        ],
        out_specs=pl.BlockSpec((tile_n, H), lambda i: (i, 0)),
        compiler_params=pltpu.CompilerParams(
            dimension_semantics=("parallel",),    # megacore / v7x 2-TC sharding
            vmem_limit_bytes=vmem_limit,
        ),
        cost_estimate=cost,
    )(x, t_col, p_table)


def rel_temporal_encoding(x, t, emb_table, w, b, *, tile_n=512,
                          table_dtype=jnp.float32):
    """out = x + emb_table[t] @ w.T + b   (PyTorch RelTemporalEncoding.forward)."""
    p_table = precompute_projected_table(emb_table, w, b, table_dtype=table_dtype)
    return rel_temporal_encoding_from_table(x, t, p_table, tile_n=tile_n)


# ----------------------------------------------------------------------------
# Module construction (deterministic, mirrors nn.Module __init__)
# ----------------------------------------------------------------------------
def build_rte_params(n_hid, max_len=240):
    assert n_hid % 2 == 0, "n_hid must be even (sin/cos interleave)"
    position = jnp.arange(0.0, max_len, dtype=jnp.float32)[:, None]          # [max_len,1]
    div_term = jnp.exp(jnp.arange(0, n_hid, 2, dtype=jnp.float32)
                       * (-(math.log(10000.0) / n_hid)))                     # [n_hid/2]
    emb = jnp.zeros((max_len, n_hid), dtype=jnp.float32)
    emb = emb.at[:, 0::2].set(jnp.sin(position * div_term) / math.sqrt(n_hid))
    emb = emb.at[:, 1::2].set(jnp.cos(position * div_term) / math.sqrt(n_hid))

    # Linear(n_hid, n_hid): deterministic init (PyTorch-style uniform bounds).
    key = jax.random.PRNGKey(42)
    kw, kb = jax.random.split(key)
    bound = 1.0 / math.sqrt(n_hid)
    w = jax.random.uniform(kw, (n_hid, n_hid), jnp.float32, -bound, bound)   # [out,in]
    b = jax.random.uniform(kb, (n_hid,), jnp.float32, -bound, bound)
    return emb, w, b


@jax.jit
def rte_forward(x, t, emb_table, w, b):
    # Exact f32 path (parity with the f32 PyTorch module).
    return rel_temporal_encoding(x, t, emb_table, w, b, table_dtype=jnp.float32)


@jax.jit
def rte_forward_bf16_table(x, t, emb_table, w, b):
    # Documented reduced-precision option: bf16 storage of the projected
    # table (halves its VMEM/DMA); the gather itself remains exact.
    return rel_temporal_encoding(x, t, emb_table, w, b, table_dtype=jnp.bfloat16)


# Pure-JAX reference for correctness checks.
def rte_reference(x, t, emb_table, w, b):
    e = jnp.take(emb_table, t, axis=0)
    return x + jnp.dot(e, w.T, precision=lax.Precision.HIGHEST) + b


if __name__ == "__main__":
    n_hid = 32
    max_len = 240

    emb_table, w, b = build_rte_params(n_hid, max_len)

    # ---- case 1: small, evenly-tiled N ----
    N = 16
    key = jax.random.PRNGKey(0)
    kx, kt = jax.random.split(key)
    x = jax.random.normal(kx, (N, n_hid), dtype=jnp.float32)
    t = jax.random.randint(kt, (N,), 0, max_len, dtype=jnp.int32)

    ref = rte_reference(x, t, emb_table, w, b)

    out = jax.block_until_ready(rte_forward(x, t, emb_table, w, b))
    assert out.shape == (N, n_hid)
    assert jnp.allclose(out, ref, atol=1e-4, rtol=1e-4), "f32 mismatch vs reference"

    out_bf = jax.block_until_ready(rte_forward_bf16_table(x, t, emb_table, w, b))
    assert out_bf.shape == (N, n_hid)
    assert jnp.allclose(out_bf, ref, atol=2e-2, rtol=2e-2), "bf16-table mismatch vs reference"

    # ---- case 2: ragged N (exercises the masked final row-tile path) ----
    N2 = 70
    kx2, kt2 = jax.random.split(jax.random.PRNGKey(1))
    x2 = jax.random.normal(kx2, (N2, n_hid), dtype=jnp.float32)
    t2 = jax.random.randint(kt2, (N2,), 0, max_len, dtype=jnp.int32)
    ref2 = rte_reference(x2, t2, emb_table, w, b)
    out2 = jax.block_until_ready(rte_forward(x2, t2, emb_table, w, b))
    assert out2.shape == (N2, n_hid)
    assert jnp.allclose(out2, ref2, atol=1e-4, rtol=1e-4), "ragged-N mismatch vs reference"

    print("KERNEL_OK")
</pallas_src>

<mosaic_0001>
module attributes {stable_mosaic.version = 11 : i64} {
  func.func @_rte_kernel(%arg0: i32, %arg1: memref<8x32xf32, #tpu.memory_space<vmem>>, %arg2: memref<8x1xi32, #tpu.memory_space<vmem>>, %arg3: memref<240x32xf32, #tpu.memory_space<vmem>>, %arg4: memref<8x32xf32, #tpu.memory_space<vmem>>) attributes {dimension_semantics = [#tpu.dimension_semantics<parallel>], iteration_bounds = array<i64: 2>, scalar_prefetch = 0 : i64, scratch_operands = 0 : i64, tpu.core_type = #tpu.core_type<tc>, window_params = [{transform_indices = @transform_0, window_bounds = array<i64: 8, 32>}, {transform_indices = @transform_1, window_bounds = array<i64: 8, 1>}, {pipeline_mode = #tpu.pipeline_mode<synchronous>, transform_indices = @transform_2, window_bounds = array<i64: 240, 32>}, {transform_indices = @transform_3, window_bounds = array<i64: 8, 32>}]} {
    %c0 = arith.constant 0 : index
    %c0_0 = arith.constant 0 : index
    %0 = vector.load %arg2[%c0, %c0_0] : memref<8x1xi32, #tpu.memory_space<vmem>>, vector<8x1xi32>
    %1 = tpu.iota {dimensions = array<i32: 1>} : vector<8x240xi32>
    %2 = vector.broadcast %0 : vector<8x1xi32> to vector<8x240xi32>
    %3 = arith.cmpi eq, %2, %1 : vector<8x240xi32>
    %4 = arith.extui %3 : vector<8x240xi1> to vector<8x240xi32>
    %5 = arith.sitofp %4 : vector<8x240xi32> to vector<8x240xf32>
    %c0_1 = arith.constant 0 : index
    %c0_2 = arith.constant 0 : index
    %6 = vector.load %arg3[%c0_1, %c0_2] : memref<240x32xf32, #tpu.memory_space<vmem>>, vector<240x32xf32>
    %cst = arith.constant dense<0.000000e+00> : vector<8x32xf32>
    %7 = tpu.matmul %5, %6, %cst {dimension_numbers = #tpu.dot_dimension_numbers<[1], [0], [0], [1], [0, 0, 1, 1], [], []>} : vector<8x240xf32>, vector<240x32xf32>, vector<8x32xf32> -> vector<8x32xf32>
    %c0_3 = arith.constant 0 : index
    %c0_4 = arith.constant 0 : index
    %8 = vector.load %arg1[%c0_3, %c0_4] : memref<8x32xf32, #tpu.memory_space<vmem>>, vector<8x32xf32>
    %9 = arith.addf %8, %7 : vector<8x32xf32>
    %c0_5 = arith.constant 0 : index
    %c0_6 = arith.constant 0 : index
    %10 = vector.load %arg4[%c0_5, %c0_6] : memref<8x32xf32, #tpu.memory_space<vmem>>, vector<8x32xf32>
    tpu.vector_store %arg4[%c0_5, %c0_6], %9 {strides = array<i32>} : memref<8x32xf32, #tpu.memory_space<vmem>>, vector<8x32xf32>,
    return
  }
  func.func @transform_0(%arg0: i32) -> (i32, i32) {
    %c0_i32 = arith.constant 0 : i32
    %c0_i32_0 = arith.constant 0 : i32
    return %arg0, %c0_i32 : i32, i32
  }
  func.func @transform_1(%arg0: i32) -> (i32, i32) {
    %c0_i32 = arith.constant 0 : i32
    %c0_i32_0 = arith.constant 0 : i32
    return %arg0, %c0_i32 : i32, i32
  }
  func.func @transform_2(%arg0: i32) -> (i32, i32) {
    %c0_i32 = arith.constant 0 : i32
    %c0_i32_0 = arith.constant 0 : i32
    %c0_i32_1 = arith.constant 0 : i32
    return %c0_i32, %c0_i32_0 : i32, i32
  }
  func.func @transform_3(%arg0: i32) -> (i32, i32) {
    %c0_i32 = arith.constant 0 : i32
    %c0_i32_0 = arith.constant 0 : i32
    return %arg0, %c0_i32 : i32, i32
  }
}

</mosaic_0001>

<bundles_post_ra>
// kernel: rte_forward.1
= control target key start
LH: loop header
LB: loop body
LE: loop exit
PB: predicated region body
PF: predicated region fallthrough
CT: control target
= control target key end

     0   :  { %8 = vsyncpa [#allocation3], 0  ;;  %s797_s0 = inlined_call_operand.vmem [shape: f32[16,32], index: 0, kind: input, shape index: {}]   ;;  %s798_s1 = inlined_call_operand.vmem [shape: s32[16,1], index: 1, kind: input, shape index: {}]   ;;  %s799_s2 = inlined_call_operand.vmem [shape: f32[240,32], index: 2, kind: input, shape index: {}]   ;;  %s800_s3 = inlined_call_operand.hbm [shape: f32[16,32], index: 3, kind: output, shape index: {}]  }
   0x1   :  { %10 = vsyncpa [#allocation3 + $0x1], 0  ;;  %s582_s12 = smov 0   ;;  %s584_s13 = smov 0  }
   0x2   :  { %s586_s14 = smov 0   ;;  %s588_s15 = smov 0  }
   0x3 LB: > { %s603_s16 = sadd.s32 4294967295, %s555_s15   ;;  %s389_s17 = sadd.s32 4294967294, %s555_s15   ;;  %s555_s15 = sphi %s588_s15, %s806_s15   ;;  %s551_s14 = sphi %s586_s14, %s805_s14   ;;  %s547_s13 = sphi %s584_s13, %s804_s13   ;;  %s543_s12 = sphi %s582_s12, %s803_s12  }
   0x4   : > { %s607_s18 = sadd.s32 1, %s555_s15   ;;  %s96_s19 = sadd.s32 1, %s551_s14 }
   0x5   : > { %s93_s20 = ssub.s32 %s555_s15, %s607_s18  ;;  %p106_p0 = scmp.ne.s32.totalorder %s551_s14, %s547_s13 }
   0x6   : > { %p94_p1 = scmp.eq.s32.totalorder %s93_s20, 0  ;;  %p107_p2 = scmp.eq.s32.totalorder %s603_s16, 1 }
   0x7   : > { %p112_p3 = scmp.ne.s32.totalorder %s547_s13, %s543_s12  ;;  %p113_p4 = scmp.eq.s32.totalorder %s389_s17, 1 }
   0x8   : > { %s618_s21 = scalar_select %p94_p1, %s551_s14, %s96_s19  }
   0x9   : > { %p620_p5 = por %p107_p2, %p106_p0  ;;  %p624_p6 = por %p113_p4, %p112_p3 }
   0xa   : > { %p392_p7 = scmp.ge.s32.totalorder %s555_s15, 1  ;;  %p148_p8 = scmp.lt.s32.totalorder %s555_s15, 3 }
   0xc   : > { %p149_p9 = pnand %p392_p7, %p148_p8 }
   0xd   : > { %p175_p10 = scmp.lt.s32.totalorder (!%p149_p9), %s603_s16, 1  ;;  %v196_v0 = vld [vmem:[%s799_s2] sm:$0xff] (!%p149_p9)  ;;  %v197_v1 = vld [vmem:[%s799_s2 + $0x8] sm:$0xff] (!%p149_p9)  ;;  %v198_v2 = vld [vmem:[%s799_s2 + $0x10] sm:$0xff] (!%p149_p9)  ;;  %v557_v3 = vmov (!%p149_p9), 0   ;;  %v558_v4 = vmov (!%p149_p9), 0.0|0.0   ;;  %v184_v48 = vlaneseq (!%p149_p9) }
   0xe   : > { %152 = sbr.rel (%p149_p9) target bundleno = 385 (0x181), region = 32  ;;  %492 = vset.pattern.permute.xlu0 (!%p149_p9), %v557_v3  ;;  %404 = vmatprep.subr.bf16.mxu0 (!%p149_p9), %v558_v4  ;;  %v405_v5 = vpack.c.bf16 (!%p149_p9), %v197_v1, %v196_v0  ;;  %v199_v6 = vld [vmem:[%s799_s2 + $0x18] sm:$0xff] (!%p149_p9)  ;;  %v200_v8 = vld [vmem:[%s799_s2 + $0x20] sm:$0xff] (!%p149_p9)  ;;  %v201_v9 = vld [vmem:[%s799_s2 + $0x28] sm:$0xff] (!%p149_p9)  ;;  %vm226_vm0 = vcmask (!%p149_p9), 916480   ;;  %v559_v52 = vmov (!%p149_p9), 0.0  }
   0xf   : > { %v408_v7 = vpack.c.bf16 (!%p149_p9), %v199_v6, %v198_v2  ;;  %v411_v11 = vpack.c.bf16 (!%p149_p9), %v201_v9, %v200_v8  ;;  %v202_v12 = vld [vmem:[%s799_s2 + $0x30] sm:$0xff] (!%p149_p9)  ;;  %v203_v13 = vld [vmem:[%s799_s2 + $0x38] sm:$0xff] (!%p149_p9)  ;;  %v204_v15 = vld [vmem:[%s799_s2 + $0x40] sm:$0xff] (!%p149_p9)  ;;  %v185_v49 = vand.u32 (!%p149_p9), 127, %v184_v48  ;;  %v560_v54 = vmov (!%p149_p9), 1.0   ;;  %s172_s20 = sand.u32 (!%p149_p9), 1, %s547_s13  }
  0x10   : > { %406 = vmatpush1.bf16.msra.mxu0 (!%p149_p9), %v405_v5  ;;  %v414_v14 = vpack.c.bf16 (!%p149_p9), %v203_v13, %v202_v12  ;;  %v205_v16 = vld [vmem:[%s799_s2 + $0x48] sm:$0xff] (!%p149_p9)  ;;  %v206_v18 = vld [vmem:[%s799_s2 + $0x50] sm:$0xff] (!%p149_p9)  ;;  %v207_v19 = vld [vmem:[%s799_s2 + $0x58] sm:$0xff] (!%p149_p9)  ;;  %s393_s24 = sshll.u32 (!%p149_p9), %s172_s20, 3  ;;  %s401_s28 = sshll.u32 (!%p149_p9), %s603_s16, 7  ;;  %vm302_vm3 = vcmask (!%p149_p9), 261120  }
  0x11   : > { %407 = vmatprep.subr.bf16.mxu0 (!%p149_p9), %v558_v4  ;;  %v417_v17 = vpack.c.bf16 (!%p149_p9), %v205_v16, %v204_v15  ;;  %v420_v20 = vpack.c.bf16 (!%p149_p9), %v207_v19, %v206_v18  ;;  %v208_v21 = vld [vmem:[%s799_s2 + $0x60] sm:$0xff] (!%p149_p9)  ;;  %v209_v22 = vld [vmem:[%s799_s2 + $0x68] sm:$0xff] (!%p149_p9)  ;;  %v210_v24 = vld [vmem:[%s799_s2 + $0x70] sm:$0xff] (!%p149_p9)  ;;  %v186_v50 = vadd.s32 (!%p149_p9), 128, %v185_v49  ;;  %s174_s29 = scalar_lea.vmem (!%p149_p9), [#allocation2], %s393_s24  ;;  %s755_s8 = scalar_lea.hbm (!%p149_p9), %s800_s3, %s401_s28 }
  0x12   : > { %v423_v23 = vpack.c.bf16 (!%p149_p9), %v209_v22, %v208_v21  ;;  %v211_v25 = vld [vmem:[%s799_s2 + $0x78] sm:$0xff] (!%p149_p9)  ;;  %v212_v27 = vld [vmem:[%s799_s2 + $0x80] sm:$0xff] (!%p149_p9)  ;;  %v213_v28 = vld [vmem:[%s799_s2 + $0x88] sm:$0xff] (!%p149_p9)  ;;  %s318_s30 = sshll.u32 (!%p149_p9), %s174_s29, 4  ;;  %s757_s30 = int_to_ptr.vmem [resolvable:$true] %s318_s30 }
  0x13   : > { %v426_v26 = vpack.c.bf16 (!%p149_p9), %v211_v25, %v210_v24  ;;  %v429_v29 = vpack.c.bf16 (!%p149_p9), %v213_v28, %v212_v27  ;;  %v214_v30 = vld [vmem:[%s799_s2 + $0x90] sm:$0xff] (!%p149_p9)  ;;  %v215_v31 = vld [vmem:[%s799_s2 + $0x98] sm:$0xff] (!%p149_p9)  ;;  %v216_v33 = vld [vmem:[%s799_s2 + $0xa0] sm:$0xff] (!%p149_p9) }
  0x14   : > { %409 = vmatpush1.bf16.msra.mxu0 (!%p149_p9), %v408_v7  ;;  %v432_v32 = vpack.c.bf16 (!%p149_p9), %v215_v31, %v214_v30  ;;  %v217_v34 = vld [vmem:[%s799_s2 + $0xa8] sm:$0xff] (!%p149_p9)  ;;  %v218_v36 = vld [vmem:[%s799_s2 + $0xb0] sm:$0xff] (!%p149_p9)  ;;  %v219_v37 = vld [vmem:[%s799_s2 + $0xb8] sm:$0xff] (!%p149_p9) }
  0x15   : > { %s645_s5 = scalar_select %p175_p10, %s603_s16, 1  ;;  %410 = vmatprep.subr.bf16.mxu0 %v558_v4  ;;  %v435_v35 = vpack.c.bf16 %v217_v34, %v216_v33  ;;  %v438_v38 = vpack.c.bf16 %v219_v37, %v218_v36  ;;  %v220_v39 = vld [vmem:[%s799_s2 + $0xc0] sm:$0xff]  ;;  %v221_v40 = vld [vmem:[%s799_s2 + $0xc8] sm:$0xff]  ;;  %v222_v42 = vld [vmem:[%s799_s2 + $0xd0] sm:$0xff] }
  0x16   : > { %v441_v41 = vpack.c.bf16 %v221_v40, %v220_v39  ;;  %v223_v43 = vld [vmem:[%s799_s2 + $0xd8] sm:$0xff]  ;;  %v224_v45 = vld [vmem:[%s799_s2 + $0xe0] sm:$0xff]  ;;  %v225_v46 = vld [vmem:[%s799_s2 + $0xe8] sm:$0xff]  ;;  %s561_s16 = smov [#allocation2]  }
  0x17   : > { %s394_s6 = sshll.u32 %s645_s5, 3  ;;  %v444_v44 = vpack.c.bf16 %v223_v43, %v222_v42  ;;  %v447_v47 = vpack.c.bf16 %v225_v46, %v224_v45  ;;  %s305_s5 = scalar_lea.sflag [#allocation3], %s172_s20 }
  0x18   : > { %s182_s19 = scalar_lea.vmem %s798_s1, %s394_s6  ;;  %412 = vmatpush1.bf16.msra.mxu0 %v411_v11  ;;  %s178_s27 = scalar_lea.vmem %s797_s0, %s394_s6 }
  0x19   : > { %v183_v10 = vld [vmem:[%s182_s19] sm:$0xff]  ;;  %413 = vmatprep.subr.bf16.mxu0 %v558_v4  ;;  %s493_s6 = scalar_lea.vmem %s757_s30, 128  ;;  %s497_s9 = sshll.u32 %s561_s16, 4  ;;  %s498_s9 = int_to_ptr.vmem [resolvable:$false] %s497_s9 }
  0x1a   : > { %188 = vperm.xlu0 %492, %v183_v10   ;;  %v300_v55 = vld [vmem:[%s178_s27] sm:$0xff]  ;;  %p494_p11 = scmp.ne.s32.totalorder %s757_s30, %s493_s6  ;;  %s499_s10 = scalar_lea.vmem %s498_s9, 256 }
  0x1b   : > { %p500_p0 = scmp.lt.s32.totalorder %s757_s30, %s498_s9  ;;  %p501_p1 = scmp.lt.s32.totalorder %s499_s10, %s493_s6 }
  0x1c   : > { %415 = vmatpush1.bf16.msra.mxu0 %v414_v14  ;;  %p495_p12 = pnand %p494_p11, %p620_p5 }
  0x1d   : > { %416 = vmatprep.subr.bf16.mxu0 %v558_v4  ;;  %p502_p2 = por %p501_p1, %p500_p0 }
  0x1e   : > { %p496_p13 = pneg %p495_p12 }
  0x20   : > { %418 = vmatpush1.bf16.msra.mxu0 %v417_v17  ;;  %p503_p3 = pnand %p502_p2, %p496_p13 }
  0x21   : > { %419 = vmatprep.subr.bf16.mxu0 %v558_v4 }
  0x24   : > { %421 = vmatpush1.bf16.msra.mxu0 %v420_v20 }
  0x25   : > { %422 = vmatprep.subr.bf16.mxu0 %v558_v4 }
  0x28   : > { %424 = vmatpush1.bf16.msra.mxu0 %v423_v23 }
  0x29   : > { %425 = vmatprep.subr.bf16.mxu0 %v558_v4 }
  0x2c   : > { %427 = vmatpush1.bf16.msra.mxu0 %v426_v26 }
  0x2d   : > { %428 = vmatprep.subr.bf16.mxu0 %v558_v4 }
  0x30   : > { %430 = vmatpush1.bf16.msra.mxu0 %v429_v29 }
  0x31   : > { %431 = vmatprep.subr.bf16.mxu0 %v558_v4 }
  0x34   : > { %433 = vmatpush1.bf16.msra.mxu0 %v432_v32 }
  0x35   : > { %434 = vmatprep.subr.bf16.mxu0 %v558_v4 }
  0x38   : > { %436 = vmatpush1.bf16.msra.mxu0 %v435_v35 }
  0x39   : > { %437 = vmatprep.subr.bf16.mxu0 %v558_v4 }
  0x3c   : > { %439 = vmatpush1.bf16.msra.mxu0 %v438_v38 }
  0x3d   : > { %440 = vmatprep.subr.bf16.mxu0 %v558_v4 }
  0x40   : > { %442 = vmatpush1.bf16.msra.mxu0 %v441_v41 }
  0x41   : > { %443 = vmatprep.subr.bf16.mxu0 %v558_v4 }
  0x44   : > { %445 = vmatpush1.bf16.msra.mxu0 %v444_v44 }
  0x45   : > { %446 = vmatprep.subr.bf16.mxu0 %v558_v4 }
  0x48   : > { %448 = vmatpush1.bf16.msra.mxu0 %v447_v47 }
  0x99   : > { %v189_v51 = vpop.permute.xlu0 %188 }
  0x9a   : > { %vm191_vm1 = vcmp.eq.s32.totalorder %v189_v51, %v186_v50  ;;  %vm190_vm2 = vcmp.eq.s32.totalorder %v189_v51, %v185_v49 }
  0x9b   : > { %v397_v53 = vsel %vm191_vm1, 1.0, %v559_v52 }
  0x9c   : > { %398 = vmatprep.mubr.msk.f32.mxu0 %vm226_vm0, %v397_v53 }
  0x9d   : > { %399 = vmatmul.mubr.msk.f32.vlgmr.msra.gmra.mrb[0].mxu0 %vm190_vm2, %v560_v54 }
 0x170   : > { %v296_v56 = vpop.f32.mrb[0].mxu0 }
 0x171   : > { %v301_v57 = vadd.f32 %v300_v55, %v296_v56  ;;  %v298_v58 = vpop.f32.mrb[1].mxu0 }
 0x173   : > { %303 = vst.msk [vmem:[%s174_s29] sm:$0xff] %vm302_vm3, %v301_v57 }
 0x174   : > { %506 = shalt.err (!%p503_p3)
}
 0x175   : > { %s507_s11 = scalar_lea.hbm %s755_s8, 128  ;;  %s511_s20 = scalar_lea.hbm %s800_s3, 256 }
 0x176   : > { %p508_p4 = scmp.ne.s32.totalorder %s755_s8, %s507_s11  ;;  %p512_p9 = scmp.lt.u32.totalorder %s755_s8, %s800_s3 }
 0x177   : > { %p513_p10 = scmp.lt.u32.totalorder %s511_s20, %s507_s11  ;;  %p515_p12 = scmp.lt.u32.totalorder %s507_s11, %s755_s8 }
 0x178   : > { %p509_p7 = pnand %p508_p4, %p620_p5 }
 0x179   : > { %p514_p11 = por %p513_p10, %p512_p9 }
 0x17a   : > { %p510_p8 = pneg %p509_p7 }
 0x17b   : > { %p516_p13 = por %p515_p12, %p514_p11 }
 0x17d   : > { %p517_p0 = pnand %p516_p13, %p510_p8 }
 0x17f   : > { %520 = shalt.err (!%p517_p0)
}
 0x180   : > { %449 = dma.vmem_to_hbm [thread:$0]  (%p620_p5), %s757_s30, 128, %s755_s8, %s305_s5  }
 0x181 PF: > { %p455_p1 = scmp.ge.s32.totalorder %s555_s15, 2  ;;  %s330_s26 = sand.u32 1, %s543_s12  }
 0x182   : > { %s331_s27 = scalar_lea.sflag [#allocation3], %s330_s26 }
 0x183   : > { %p452_p2 = pnand %p455_p1, %p624_p6 }
 0x185   : > { %538 = dma.done.wait (!%p452_p2), %s331_s27, 128  }
 0x186   : > { %540 = vsyncadd (!%p452_p2), %s331_s27, 4294967168  ;;  %p13_p3 = scmp.ge.s32.totalorder %s607_s18, 4   ;;  %s803_s12 = smov %s547_s13 }
 0x187   : > { %s804_s13 = smov %s551_s14  ;;  %s805_s14 = smov %s618_s21 }
 0x188   : > { %s806_s15 = smov %s607_s18  ;;  %15 = sbr.rel (!%p13_p3) target bundleno = 3 (0x3), region = 70 }
 0x18f   :  { %336 = vsyncpa [#allocation3], 1 }
 0x190   :  { %338 = vsyncpa [#allocation3 + $0x1], 1 }

</bundles_post_ra>
